<compile_context>
chip_gen: v7x
topology: tpu7x:2x2x1
jax: 0.10.0
libtpu: 0.0.40
codegen_flags: <defaults>
</compile_context>

<pallas_src>
import functools

import jax
import jax.numpy as jnp
from jax.experimental import pallas as pl
from jax.experimental.pallas import tpu as pltpu

LN_EPS = 1e-5

# Scoped-VMEM budget: 48 MiB is safely below physical VMEM on every current
# generation (v5e/v6e: 128 MiB, v7x: 64 MiB) while unlocking 256-512 row tiles.
_VMEM_LIMIT_BYTES = 48 * 1024 * 1024


def _round_up(x, m):
    return (x + m - 1) // m * m


def postnorm_kernel(x_ref, w_ref, b_ref, gamma_ref, beta_ref, o_ref, *, d_valid):
    """One row-tile of  LayerNorm(x @ W^T + b) * gamma + beta.

    x_ref:              (TM, Dp) activation tile, native dtype (bf16 OK on MXU)
    w_ref:              (Dp, Dp) nn.Linear weight in (out, in) layout
    b/gamma/beta_ref:   (1, Dp)  f32
    o_ref:              (TM, Dp)
    d_valid:            number of real (unpadded) model-dim lanes (static)
    """
    x = x_ref[...]
    w = w_ref[...]

    # fn(x) = x @ W^T + b. Contract on W's *second* axis directly (no transpose
    # materialised anywhere); the MXU accumulates in f32.
    y = jax.lax.dot_general(
        x, w,
        dimension_numbers=(((1,), (1,)), ((), ())),
        preferred_element_type=jnp.float32,
    )
    y = y + b_ref[...]  # bias already f32

    d_pad = y.shape[-1]
    if d_valid == d_pad:
        # Lane axis is exactly the model dim: plain LayerNorm.
        mean = jnp.mean(y, axis=-1, keepdims=True)
        centered = y - mean
        var = jnp.mean(centered * centered, axis=-1, keepdims=True)
    else:
        # Model dim was zero-padded up to a multiple of 128: reduce over the
        # valid lanes only (padded lanes of y are exactly zero by construction,
        # but the divisor must be d_valid, so mask explicitly).
        lane = jax.lax.broadcasted_iota(jnp.int32, (1, d_pad), 1)
        valid = lane < d_valid
        inv_d = jnp.float32(1.0 / d_valid)
        ym = jnp.where(valid, y, 0.0)
        mean = jnp.sum(ym, axis=-1, keepdims=True) * inv_d
        centered = y - mean
        cm = jnp.where(valid, centered, 0.0)
        var = jnp.sum(cm * cm, axis=-1, keepdims=True) * inv_d

    y_hat = centered * jax.lax.rsqrt(var + LN_EPS)
    # Padded gamma/beta lanes are zero, so padded output lanes are zero too.
    o_ref[...] = (y_hat * gamma_ref[...] + beta_ref[...]).astype(o_ref.dtype)


def postnorm(x, w, b, gamma, beta, *, tm=256):
    """x: (B, S, D). w: (D, D) nn.Linear weight (out, in). Returns (B, S, D)."""
    B, S, D = x.shape
    rows = B * S

    # Lane-dense layout: pad the model dim to a multiple of 128.
    d_pad = _round_up(D, 128)
    # Row tile: big enough to fill the MXU / amortise per-grid-step overhead,
    # never bigger than the (sublane-rounded) problem.
    tm = _round_up(max(8, min(tm, _round_up(rows, 8))), 8)
    rows_pad = _round_up(rows, tm)

    x2 = x.reshape(rows, D)
    if rows_pad != rows or d_pad != D:
        x2 = jnp.pad(x2, ((0, rows_pad - rows), (0, d_pad - D)))
    w2 = w if d_pad == D else jnp.pad(w, ((0, d_pad - D), (0, d_pad - D)))
    # Bias / LN params stay f32 regardless of activation dtype.
    pad1 = (0, d_pad - D)
    b2 = jnp.pad(b.astype(jnp.float32), pad1).reshape(1, d_pad)
    g2 = jnp.pad(gamma.astype(jnp.float32), pad1).reshape(1, d_pad)
    be2 = jnp.pad(beta.astype(jnp.float32), pad1).reshape(1, d_pad)

    grid = (rows_pad // tm,)
    kernel = functools.partial(postnorm_kernel, d_valid=D)

    # NOTE: for very large D (f32 weight >~16 MiB, hits v7x's 64 MiB VMEM first)
    # add a K grid axis ("arbitrary") with an f32 VMEM accumulator so the weight
    # streams in (tk, d_pad) slices instead of being held whole.

    def build(single_buffer_invariants):
        def const_spec(shape):
            if single_buffer_invariants:
                # Grid-invariant operands: one resident VMEM copy, no double buffer.
                return pl.BlockSpec(shape, lambda i: (0, 0),
                                    pipeline_mode=pl.Buffered(1))
            return pl.BlockSpec(shape, lambda i: (0, 0))

        return pl.pallas_call(
            kernel,
            out_shape=jax.ShapeDtypeStruct((rows_pad, d_pad), x.dtype),
            grid_spec=pltpu.PrefetchScalarGridSpec(
                num_scalar_prefetch=0,
                grid=grid,
                in_specs=[
                    pl.BlockSpec((tm, d_pad), lambda i: (i, 0)),  # x row tile
                    const_spec((d_pad, d_pad)),                   # weight (out, in)
                    const_spec((1, d_pad)),                       # bias
                    const_spec((1, d_pad)),                       # LN gamma
                    const_spec((1, d_pad)),                       # LN beta
                ],
                out_specs=pl.BlockSpec((tm, d_pad), lambda i: (i, 0)),
            ),
            compiler_params=pltpu.CompilerParams(
                dimension_semantics=("parallel",),
                vmem_limit_bytes=_VMEM_LIMIT_BYTES,
            ),
        )

    try:
        out = build(True)(x2, w2, b2, g2, be2)
    except Exception:
        # pipeline_mode=pl.Buffered(1) not supported by this jax build; the
        # constant index_map still lets Pallas skip redundant re-fetches.
        out = build(False)(x2, w2, b2, g2, be2)

    return out[:rows, :D].reshape(B, S, D)


def postnorm_ref(x, w, b, gamma, beta):
    y = jnp.einsum("bsd,od->bso", x, w) + b
    mean = jnp.mean(y, axis=-1, keepdims=True)
    var = jnp.mean((y - mean) ** 2, axis=-1, keepdims=True)
    return (y - mean) / jnp.sqrt(var + LN_EPS) * gamma + beta


if __name__ == "__main__":
    key = jax.random.PRNGKey(0)
    B, S, D = 2, 8, 32

    kx, kw, kb = jax.random.split(key, 3)
    x = jax.random.normal(kx, (B, S, D), dtype=jnp.float32)
    # fn = nn.Linear(D, D): weight (out, in), bias (out,)
    w = jax.random.normal(kw, (D, D), dtype=jnp.float32) * (1.0 / jnp.sqrt(D))
    b = jax.random.normal(kb, (D,), dtype=jnp.float32) * 0.01
    # nn.LayerNorm(D) default init: gamma=1, beta=0
    gamma = jnp.ones((D,), dtype=jnp.float32)
    beta = jnp.zeros((D,), dtype=jnp.float32)

    out = postnorm(x, w, b, gamma, beta)
    out = jax.block_until_ready(out)

    ref = postnorm_ref(x, w, b, gamma, beta)
    assert out.shape == (B, S, D)
    assert jnp.allclose(out, ref, atol=2e-5, rtol=2e-5), "mismatch vs reference"

    print("KERNEL_OK")
</pallas_src>

<mosaic_0001>
module attributes {stable_mosaic.version = 11 : i64} {
  func.func @postnorm_kernel(%arg0: i32, %arg1: memref<16x128xf32, #tpu.memory_space<vmem>>, %arg2: memref<128x128xf32, #tpu.memory_space<vmem>>, %arg3: memref<1x128xf32, #tpu.memory_space<vmem>>, %arg4: memref<1x128xf32, #tpu.memory_space<vmem>>, %arg5: memref<1x128xf32, #tpu.memory_space<vmem>>, %arg6: memref<16x128xf32, #tpu.memory_space<vmem>>) attributes {dimension_semantics = [#tpu.dimension_semantics<parallel>], iteration_bounds = array<i64: 1>, scalar_prefetch = 0 : i64, scratch_operands = 0 : i64, tpu.core_type = #tpu.core_type<tc>, window_params = [{transform_indices = @transform_0, window_bounds = array<i64: 16, 128>}, {pipeline_mode = #tpu.pipeline_mode<synchronous>, transform_indices = @transform_1, window_bounds = array<i64: 128, 128>}, {pipeline_mode = #tpu.pipeline_mode<synchronous>, transform_indices = @transform_2, window_bounds = array<i64: 1, 128>}, {pipeline_mode = #tpu.pipeline_mode<synchronous>, transform_indices = @transform_3, window_bounds = array<i64: 1, 128>}, {pipeline_mode = #tpu.pipeline_mode<synchronous>, transform_indices = @transform_4, window_bounds = array<i64: 1, 128>}, {transform_indices = @transform_5, window_bounds = array<i64: 16, 128>}]} {
    %c0 = arith.constant 0 : index
    %c0_0 = arith.constant 0 : index
    %0 = vector.load %arg1[%c0, %c0_0] : memref<16x128xf32, #tpu.memory_space<vmem>>, vector<16x128xf32>
    %c0_1 = arith.constant 0 : index
    %c0_2 = arith.constant 0 : index
    %1 = vector.load %arg2[%c0_1, %c0_2] : memref<128x128xf32, #tpu.memory_space<vmem>>, vector<128x128xf32>
    %cst = arith.constant dense<0.000000e+00> : vector<16x128xf32>
    %2 = tpu.matmul %0, %1, %cst {dimension_numbers = #tpu.dot_dimension_numbers<[1], [1], [0], [0], [0, 0, 1, 0], [], []>} : vector<16x128xf32>, vector<128x128xf32>, vector<16x128xf32> -> vector<16x128xf32>
    %c0_3 = arith.constant 0 : index
    %c0_4 = arith.constant 0 : index
    %3 = vector.load %arg3[%c0_3, %c0_4] : memref<1x128xf32, #tpu.memory_space<vmem>>, vector<1x128xf32>
    %4 = vector.broadcast %3 : vector<1x128xf32> to vector<16x128xf32>
    %5 = arith.addf %2, %4 : vector<16x128xf32>
    %6 = tpu.iota {dimensions = array<i32: 1>} : vector<1x128xi32>
    %c32_i32 = arith.constant 32 : i32
    %7 = vector.broadcast %c32_i32 : i32 to vector<1x128xi32>
    %8 = arith.cmpi slt, %6, %7 : vector<1x128xi32>
    %cst_5 = arith.constant 0.000000e+00 : f32
    %9 = vector.shape_cast %8 : vector<1x128xi1> to vector<1x128xi1>
    %10 = vector.broadcast %9 : vector<1x128xi1> to vector<16x128xi1>
    %11 = vector.broadcast %cst_5 : f32 to vector<16x128xf32>
    %12 = arith.select %10, %5, %11 : vector<16x128xi1>, vector<16x128xf32>
    %cst_6 = arith.constant dense<0.000000e+00> : vector<16xf32>
    %13 = vector.multi_reduction <add>, %12, %cst_6 [1] : vector<16x128xf32> to vector<16xf32>
    %14 = vector.shape_cast %13 : vector<16xf32> to vector<16x1xf32>
    %cst_7 = arith.constant 3.125000e-02 : f32
    %15 = vector.broadcast %cst_7 : f32 to vector<16x1xf32>
    %16 = arith.mulf %14, %15 : vector<16x1xf32>
    %17 = vector.broadcast %16 : vector<16x1xf32> to vector<16x128xf32>
    %18 = arith.subf %5, %17 : vector<16x128xf32>
    %cst_8 = arith.constant 0.000000e+00 : f32
    %19 = vector.shape_cast %8 : vector<1x128xi1> to vector<1x128xi1>
    %20 = vector.broadcast %19 : vector<1x128xi1> to vector<16x128xi1>
    %21 = vector.broadcast %cst_8 : f32 to vector<16x128xf32>
    %22 = arith.select %20, %18, %21 : vector<16x128xi1>, vector<16x128xf32>
    %23 = arith.mulf %22, %22 : vector<16x128xf32>
    %cst_9 = arith.constant dense<0.000000e+00> : vector<16xf32>
    %24 = vector.multi_reduction <add>, %23, %cst_9 [1] : vector<16x128xf32> to vector<16xf32>
    %25 = vector.shape_cast %24 : vector<16xf32> to vector<16x1xf32>
    %cst_10 = arith.constant 3.125000e-02 : f32
    %26 = vector.broadcast %cst_10 : f32 to vector<16x1xf32>
    %27 = arith.mulf %25, %26 : vector<16x1xf32>
    %cst_11 = arith.constant 9.99999974E-6 : f32
    %28 = vector.broadcast %cst_11 : f32 to vector<16x1xf32>
    %29 = arith.addf %27, %28 : vector<16x1xf32>
    %30 = math.rsqrt %29 : vector<16x1xf32>
    %31 = vector.broadcast %30 : vector<16x1xf32> to vector<16x128xf32>
    %32 = arith.mulf %18, %31 : vector<16x128xf32>
    %c0_12 = arith.constant 0 : index
    %c0_13 = arith.constant 0 : index
    %33 = vector.load %arg4[%c0_12, %c0_13] : memref<1x128xf32, #tpu.memory_space<vmem>>, vector<1x128xf32>
    %34 = vector.broadcast %33 : vector<1x128xf32> to vector<16x128xf32>
    %35 = arith.mulf %32, %34 : vector<16x128xf32>
    %c0_14 = arith.constant 0 : index
    %c0_15 = arith.constant 0 : index
    %36 = vector.load %arg5[%c0_14, %c0_15] : memref<1x128xf32, #tpu.memory_space<vmem>>, vector<1x128xf32>
    %37 = vector.broadcast %36 : vector<1x128xf32> to vector<16x128xf32>
    %38 = arith.addf %35, %37 : vector<16x128xf32>
    %c0_16 = arith.constant 0 : index
    %c0_17 = arith.constant 0 : index
    %39 = vector.load %arg6[%c0_16, %c0_17] : memref<16x128xf32, #tpu.memory_space<vmem>>, vector<16x128xf32>
    tpu.vector_store %arg6[%c0_16, %c0_17], %38 {strides = array<i32>} : memref<16x128xf32, #tpu.memory_space<vmem>>, vector<16x128xf32>,
    return
  }
  func.func @transform_0(%arg0: i32) -> (i32, i32) {
    %c0_i32 = arith.constant 0 : i32
    %c0_i32_0 = arith.constant 0 : i32
    return %arg0, %c0_i32 : i32, i32
  }
  func.func @transform_1(%arg0: i32) -> (i32, i32) {
    %c0_i32 = arith.constant 0 : i32
    %c0_i32_0 = arith.constant 0 : i32
    %c0_i32_1 = arith.constant 0 : i32
    return %c0_i32, %c0_i32_0 : i32, i32
  }
  func.func @transform_2(%arg0: i32) -> (i32, i32) {
    %c0_i32 = arith.constant 0 : i32
    %c0_i32_0 = arith.constant 0 : i32
    %c0_i32_1 = arith.constant 0 : i32
    return %c0_i32, %c0_i32_0 : i32, i32
  }
  func.func @transform_3(%arg0: i32) -> (i32, i32) {
    %c0_i32 = arith.constant 0 : i32
    %c0_i32_0 = arith.constant 0 : i32
    %c0_i32_1 = arith.constant 0 : i32
    return %c0_i32, %c0_i32_0 : i32, i32
  }
  func.func @transform_4(%arg0: i32) -> (i32, i32) {
    %c0_i32 = arith.constant 0 : i32
    %c0_i32_0 = arith.constant 0 : i32
    %c0_i32_1 = arith.constant 0 : i32
    return %c0_i32, %c0_i32_0 : i32, i32
  }
  func.func @transform_5(%arg0: i32) -> (i32, i32) {
    %c0_i32 = arith.constant 0 : i32
    %c0_i32_0 = arith.constant 0 : i32
    return %arg0, %c0_i32 : i32, i32
  }
}

module attributes {stable_mosaic.version = 11 : i64} {
  func.func @postnorm_kernel(%arg0: i32, %arg1: memref<16x128xf32, #tpu.memory_space<vmem>>, %arg2: memref<128x128xf32, #tpu.memory_space<vmem>>, %arg3: memref<1x128xf32, #tpu.memory_space<vmem>>, %arg4: memref<1x128xf32, #tpu.memory_space<vmem>>, %arg5: memref<1x128xf32, #tpu.memory_space<vmem>>, %arg6: memref<16x128xf32, #tpu.memory_space<vmem>>) attributes {dimension_semantics = [#tpu.dimension_semantics<parallel>], iteration_bounds = array<i64: 1>, scalar_prefetch = 0 : i64, scratch_operands = 0 : i64, tpu.core_type = #tpu.core_type<tc>, window_params = [{transform_indices = @transform_0, window_bounds = array<i64: 16, 128>}, {pipeline_mode = #tpu.pipeline_mode<synchronous>, transform_indices = @transform_1, window_bounds = array<i64: 128, 128>}, {pipeline_mode = #tpu.pipeline_mode<synchronous>, transform_indices = @transform_2, window_bounds = array<i64: 1, 128>}, {pipeline_mode = #tpu.pipeline_mode<synchronous>, transform_indices = @transform_3, window_bounds = array<i64: 1, 128>}, {pipeline_mode = #tpu.pipeline_mode<synchronous>, transform_indices = @transform_4, window_bounds = array<i64: 1, 128>}, {transform_indices = @transform_5, window_bounds = array<i64: 16, 128>}]} {
    %c0 = arith.constant 0 : index
    %c0_0 = arith.constant 0 : index
    %0 = vector.load %arg1[%c0, %c0_0] : memref<16x128xf32, #tpu.memory_space<vmem>>, vector<16x128xf32>
    %c0_1 = arith.constant 0 : index
    %c0_2 = arith.constant 0 : index
    %1 = vector.load %arg2[%c0_1, %c0_2] : memref<128x128xf32, #tpu.memory_space<vmem>>, vector<128x128xf32>
    %cst = arith.constant dense<0.000000e+00> : vector<16x128xf32>
    %2 = tpu.matmul %0, %1, %cst {dimension_numbers = #tpu.dot_dimension_numbers<[1], [1], [0], [0], [0, 0, 1, 0], [], []>} : vector<16x128xf32>, vector<128x128xf32>, vector<16x128xf32> -> vector<16x128xf32>
    %c0_3 = arith.constant 0 : index
    %c0_4 = arith.constant 0 : index
    %3 = vector.load %arg3[%c0_3, %c0_4] : memref<1x128xf32, #tpu.memory_space<vmem>>, vector<1x128xf32>
    %4 = vector.broadcast %3 : vector<1x128xf32> to vector<16x128xf32>
    %5 = arith.addf %2, %4 : vector<16x128xf32>
    %6 = tpu.iota {dimensions = array<i32: 1>} : vector<1x128xi32>
    %c32_i32 = arith.constant 32 : i32
    %7 = vector.broadcast %c32_i32 : i32 to vector<1x128xi32>
    %8 = arith.cmpi slt, %6, %7 : vector<1x128xi32>
    %cst_5 = arith.constant 0.000000e+00 : f32
    %9 = vector.shape_cast %8 : vector<1x128xi1> to vector<1x128xi1>
    %10 = vector.broadcast %9 : vector<1x128xi1> to vector<16x128xi1>
    %11 = vector.broadcast %cst_5 : f32 to vector<16x128xf32>
    %12 = arith.select %10, %5, %11 : vector<16x128xi1>, vector<16x128xf32>
    %cst_6 = arith.constant dense<0.000000e+00> : vector<16xf32>
    %13 = vector.multi_reduction <add>, %12, %cst_6 [1] : vector<16x128xf32> to vector<16xf32>
    %14 = vector.shape_cast %13 : vector<16xf32> to vector<16x1xf32>
    %cst_7 = arith.constant 3.125000e-02 : f32
    %15 = vector.broadcast %cst_7 : f32 to vector<16x1xf32>
    %16 = arith.mulf %14, %15 : vector<16x1xf32>
    %17 = vector.broadcast %16 : vector<16x1xf32> to vector<16x128xf32>
    %18 = arith.subf %5, %17 : vector<16x128xf32>
    %cst_8 = arith.constant 0.000000e+00 : f32
    %19 = vector.shape_cast %8 : vector<1x128xi1> to vector<1x128xi1>
    %20 = vector.broadcast %19 : vector<1x128xi1> to vector<16x128xi1>
    %21 = vector.broadcast %cst_8 : f32 to vector<16x128xf32>
    %22 = arith.select %20, %18, %21 : vector<16x128xi1>, vector<16x128xf32>
    %23 = arith.mulf %22, %22 : vector<16x128xf32>
    %cst_9 = arith.constant dense<0.000000e+00> : vector<16xf32>
    %24 = vector.multi_reduction <add>, %23, %cst_9 [1] : vector<16x128xf32> to vector<16xf32>
    %25 = vector.shape_cast %24 : vector<16xf32> to vector<16x1xf32>
    %cst_10 = arith.constant 3.125000e-02 : f32
    %26 = vector.broadcast %cst_10 : f32 to vector<16x1xf32>
    %27 = arith.mulf %25, %26 : vector<16x1xf32>
    %cst_11 = arith.constant 9.99999974E-6 : f32
    %28 = vector.broadcast %cst_11 : f32 to vector<16x1xf32>
    %29 = arith.addf %27, %28 : vector<16x1xf32>
    %30 = math.rsqrt %29 : vector<16x1xf32>
    %31 = vector.broadcast %30 : vector<16x1xf32> to vector<16x128xf32>
    %32 = arith.mulf %18, %31 : vector<16x128xf32>
    %c0_12 = arith.constant 0 : index
    %c0_13 = arith.constant 0 : index
    %33 = vector.load %arg4[%c0_12, %c0_13] : memref<1x128xf32, #tpu.memory_space<vmem>>, vector<1x128xf32>
    %34 = vector.broadcast %33 : vector<1x128xf32> to vector<16x128xf32>
    %35 = arith.mulf %32, %34 : vector<16x128xf32>
    %c0_14 = arith.constant 0 : index
    %c0_15 = arith.constant 0 : index
    %36 = vector.load %arg5[%c0_14, %c0_15] : memref<1x128xf32, #tpu.memory_space<vmem>>, vector<1x128xf32>
    %37 = vector.broadcast %36 : vector<1x128xf32> to vector<16x128xf32>
    %38 = arith.addf %35, %37 : vector<16x128xf32>
    %c0_16 = arith.constant 0 : index
    %c0_17 = arith.constant 0 : index
    %39 = vector.load %arg6[%c0_16, %c0_17] : memref<16x128xf32, #tpu.memory_space<vmem>>, vector<16x128xf32>
    tpu.vector_store %arg6[%c0_16, %c0_17], %38 {strides = array<i32>} : memref<16x128xf32, #tpu.memory_space<vmem>>, vector<16x128xf32>,
    return
  }
  func.func @transform_0(%arg0: i32) -> (i32, i32) {
    %c0_i32 = arith.constant 0 : i32
    %c0_i32_0 = arith.constant 0 : i32
    return %arg0, %c0_i32 : i32, i32
  }
  func.func @transform_1(%arg0: i32) -> (i32, i32) {
    %c0_i32 = arith.constant 0 : i32
    %c0_i32_0 = arith.constant 0 : i32
    %c0_i32_1 = arith.constant 0 : i32
    return %c0_i32, %c0_i32_0 : i32, i32
  }
  func.func @transform_2(%arg0: i32) -> (i32, i32) {
    %c0_i32 = arith.constant 0 : i32
    %c0_i32_0 = arith.constant 0 : i32
    %c0_i32_1 = arith.constant 0 : i32
    return %c0_i32, %c0_i32_0 : i32, i32
  }
  func.func @transform_3(%arg0: i32) -> (i32, i32) {
    %c0_i32 = arith.constant 0 : i32
    %c0_i32_0 = arith.constant 0 : i32
    %c0_i32_1 = arith.constant 0 : i32
    return %c0_i32, %c0_i32_0 : i32, i32
  }
  func.func @transform_4(%arg0: i32) -> (i32, i32) {
    %c0_i32 = arith.constant 0 : i32
    %c0_i32_0 = arith.constant 0 : i32
    %c0_i32_1 = arith.constant 0 : i32
    return %c0_i32, %c0_i32_0 : i32, i32
  }
  func.func @transform_5(%arg0: i32) -> (i32, i32) {
    %c0_i32 = arith.constant 0 : i32
    %c0_i32_0 = arith.constant 0 : i32
    return %arg0, %c0_i32 : i32, i32
  }
}

</mosaic_0001>

<bundles_post_ra>
// kernel: tpu_custom_call.1
= control target key start
LH: loop header
LB: loop body
LE: loop exit
PB: predicated region body
PF: predicated region fallthrough
CT: control target
= control target key end

     0   :  { %10 = vsyncpa [#allocation3], 0  ;;  %s480_s0 = inlined_call_operand.hbm [shape: f32[16,128], index: 0, kind: input, shape index: {}]   ;;  %s481_s1 = inlined_call_operand.hbm [shape: f32[128,128], index: 1, kind: input, shape index: {}]   ;;  %s482_s2 = inlined_call_operand.vmem [shape: f32[1,128], index: 2, kind: input, shape index: {}]   ;;  %s483_s3 = inlined_call_operand.vmem [shape: f32[1,128], index: 3, kind: input, shape index: {}]   ;;  %s484_s4 = inlined_call_operand.vmem [shape: f32[1,128], index: 4, kind: input, shape index: {}]   ;;  %s485_s5 = inlined_call_operand.hbm [shape: f32[16,128], index: 5, kind: output, shape index: {}]  }
   0x1   :  { %11 = vsyncpa [#allocation6], 0 }
   0x2   :  { %12 = vsyncpa [#allocation4], 0  ;;  %s387_s18 = smov [#allocation2]   ;;  %s315_s22 = scalar_lea.hbm %s480_s0, 256 }
   0x3   :  { %s18_s19 = sshll.u32 %s387_s18, 4  ;;  %p316_p0 = scmp.ne.s32.totalorder %s480_s0, %s315_s22  ;;  %s19_s19 = int_to_ptr.vmem [resolvable:$true] %s18_s19 }
   0x4   :  { %p319_p1 = scmp.lt.u32.totalorder %s315_s22, %s480_s0 }
   0x6   :  { %p321_p2 = pnand %p319_p1, %p316_p0 }
   0x8   :  { %324 = shalt.err (!%p321_p2)
}
   0x9   :  { %s325_s27 = scalar_lea.vmem %s19_s19, 256  ;;  %p330_p4 = scmp.lt.s32.totalorder %s19_s19, %s19_s19 }
   0xa   :  { %p326_p3 = scmp.ne.s32.totalorder %s19_s19, %s325_s27  ;;  %p331_p5 = scmp.lt.s32.totalorder %s325_s27, %s325_s27 }
   0xc   :  { %p332_p6 = por %p331_p5, %p330_p4 }
   0xe   :  { %p333_p7 = pnand %p332_p6, %p326_p3 }
  0x10   :  { %336 = shalt.err (!%p333_p7)
}
  0x11   :  { %s388_s28 = smov 128   ;;  %s389_s29 = smov 8  }
  0x12   :  { %24 = dma.hbm_to_vmem [thread:$0]  %s480_s0, 256, %s19_s19, [#allocation3], %s388_s28, %s388_s28, %s389_s29  }
  0x13   :  { %s390_s7 = smov [#allocation5]   ;;  %s337_s11 = scalar_lea.hbm %s481_s1, 2048 }
  0x14   :  { %s30_s8 = sshll.u32 %s390_s7, 4  ;;  %p338_p8 = scmp.ne.s32.totalorder %s481_s1, %s337_s11  ;;  %s31_s8 = int_to_ptr.vmem [resolvable:$true] %s30_s8 }
  0x15   :  { %p341_p9 = scmp.lt.u32.totalorder %s337_s11, %s481_s1 }
  0x17   :  { %p343_p10 = pnand %p341_p9, %p338_p8 }
  0x19   :  { %346 = shalt.err (!%p343_p10)
}
  0x1a   :  { %s347_s16 = scalar_lea.vmem %s31_s8, 2048  ;;  %p352_p12 = scmp.lt.s32.totalorder %s31_s8, %s31_s8 }
  0x1b   :  { %p348_p11 = scmp.ne.s32.totalorder %s31_s8, %s347_s16  ;;  %p353_p13 = scmp.lt.s32.totalorder %s347_s16, %s347_s16 }
  0x1d   :  { %p354_p0 = por %p353_p13, %p352_p12 }
  0x1f   :  { %p355_p1 = pnand %p354_p0, %p348_p11 }
  0x21   :  { %358 = shalt.err (!%p355_p1)
}
  0x22   :  { %36 = dma.hbm_to_vmem [thread:$0]  %s481_s1, 2048, %s31_s8, [#allocation6], %s388_s28, %s388_s28, %s389_s29  }
  0x23   :  { %381 = dma.done.wait [#allocation3], 256  }
  0x24   :  { %382 = vsyncadd [#allocation3], 4294967040 }
  0x25   :  { %383 = dma.done.wait [#allocation6], 2048  }
  0x26   :  { %384 = vsyncadd [#allocation6], 4294965248  ;;  %v51_v0 = vld [vmem:[#allocation5] sm:$0xff]  ;;  %v52_v1 = vld [vmem:[#allocation5 + $0x8] sm:$0xff]  ;;  %v149_v26 = vlaneseq  ;;  %s391_s22 = smov [#allocation7]  }
  0x27   :  { %v53_v2 = vld [vmem:[#allocation5 + $0x10] sm:$0xff]  ;;  %v274_v3 = vpack.c.bf16 %v52_v1, %v51_v0  ;;  %v54_v4 = vld [vmem:[#allocation5 + $0x18] sm:$0xff]  ;;  %v55_v7 = vld [vmem:[#allocation5 + $0x20] sm:$0xff]  ;;  %s205_s23 = sshll.u32 %s391_s22, 4  ;;  %s206_s23 = int_to_ptr.vmem [resolvable:$true] %s205_s23 }
  0x28   :  { %v278_v5 = vpack.c.bf16 %v54_v4, %v53_v2  ;;  %v49_v6 = vld [vmem:[#allocation2] sm:$0xff]  ;;  %v56_v8 = vld [vmem:[#allocation5 + $0x28] sm:$0xff]  ;;  %v58_v11 = vld [vmem:[#allocation5 + $0x38] sm:$0xff]  ;;  %v150_v27 = vand.u32 127, %v149_v26  ;;  %s359_s24 = scalar_lea.vmem %s206_s23, 256  ;;  %p364_p3 = scmp.lt.s32.totalorder %s206_s23, %s206_s23 }
  0x29   :  { %275 = vmatprep.subr.bf16.mxu0 %v274_v3  ;;  %271 = vmatprep.mubr.f32.mxu0 %v49_v6  ;;  %v282_v9 = vpack.c.bf16 %v56_v8, %v55_v7  ;;  %v57_v10 = vld [vmem:[#allocation5 + $0x30] sm:$0xff]  ;;  %v59_v13 = vld [vmem:[#allocation5 + $0x40] sm:$0xff]  ;;  %v60_v14 = vld [vmem:[#allocation5 + $0x48] sm:$0xff]  ;;  %p360_p2 = scmp.ne.s32.totalorder %s206_s23, %s359_s24  ;;  %p365_p4 = scmp.lt.s32.totalorder %s359_s24, %s359_s24 }
  0x2a   :  { %277 = vmatpush3.bf16.xpose.msra.mxu0 %v274_v3  ;;  %v286_v12 = vpack.c.bf16 %v58_v11, %v57_v10  ;;  %v290_v15 = vpack.c.bf16 %v60_v14, %v59_v13  ;;  %v61_v16 = vld [vmem:[#allocation5 + $0x50] sm:$0xff]  ;;  %v62_v17 = vld [vmem:[#allocation5 + $0x58] sm:$0xff]  ;;  %v63_v19 = vld [vmem:[#allocation5 + $0x60] sm:$0xff]  ;;  %vm151_vm0 = vcmp.lt.s32.totalorder %v150_v27, 32 }
  0x2b   :  { %279 = vmatprep.subr.bf16.mxu0 %v278_v5  ;;  %v294_v18 = vpack.c.bf16 %v62_v17, %v61_v16  ;;  %v64_v20 = vld [vmem:[#allocation5 + $0x68] sm:$0xff]  ;;  %v65_v22 = vld [vmem:[#allocation5 + $0x70] sm:$0xff]  ;;  %v66_v23 = vld [vmem:[#allocation5 + $0x78] sm:$0xff]  ;;  %p366_p5 = por %p365_p4, %p364_p3 }
  0x2c   :  { %v298_v21 = vpack.c.bf16 %v64_v20, %v63_v19  ;;  %v302_v24 = vpack.c.bf16 %v66_v23, %v65_v22  ;;  %v50_v25 = vld [vmem:[#allocation2 + $0x8] sm:$0xff]  ;;  %v218_v28 = vld [vmem:[%s482_s2] ss:$0 sm:$0xff] }
  0x2d   :  { %v219_v52 = vld [vmem:[%s483_s3] ss:$0 sm:$0xff]  ;;  %p367_p6 = pnand %p366_p5, %p360_p2 }
  0x2e   :  { %v220_v54 = vld [vmem:[%s484_s4] ss:$0 sm:$0xff] }
  0x32   :  { %281 = vmatpush3.bf16.xpose.msra.mxu0 %v278_v5 }
  0x33   :  { %283 = vmatprep.subr.bf16.mxu0 %v282_v9 }
  0x3a   :  { %285 = vmatpush3.bf16.xpose.msra.mxu0 %v282_v9 }
  0x3b   :  { %287 = vmatprep.subr.bf16.mxu0 %v286_v12 }
  0x42   :  { %289 = vmatpush3.bf16.xpose.msra.mxu0 %v286_v12 }
  0x43   :  { %291 = vmatprep.subr.bf16.mxu0 %v290_v15 }
  0x4a   :  { %293 = vmatpush3.bf16.xpose.msra.mxu0 %v290_v15 }
  0x4b   :  { %295 = vmatprep.subr.bf16.mxu0 %v294_v18 }
  0x52   :  { %297 = vmatpush3.bf16.xpose.msra.mxu0 %v294_v18 }
  0x53   :  { %299 = vmatprep.subr.bf16.mxu0 %v298_v21 }
  0x5a   :  { %301 = vmatpush3.bf16.xpose.msra.mxu0 %v298_v21 }
  0x5b   :  { %303 = vmatprep.subr.bf16.mxu0 %v302_v24 }
  0x62   :  { %305 = vmatpush3.bf16.xpose.msra.mxu0 %v302_v24 }
  0x69   :  { %272 = vmatmul.mubr.f32.vlgmr.msra.gmra.mrb[0].mxu0 %v50_v25 }
 0x13c   :  { %v273_v29 = vpop.f32.mrb[0].mxu0 }
 0x13d   :  { %v140_v30 = vpop.f32.mrb[1].mxu0  ;;  %v146_v32 = vadd.f32 %v273_v29, %v218_v28 }
 0x13e   :  { %v141_v31 = vadd.f32 %v218_v28, %v140_v30 }
 0x13f   :  { %v155_v34 = vsel %vm151_vm0, %v146_v32, 0.0 }
 0x140   :  { %v154_v33 = vsel %vm151_vm0, %v141_v31, 0.0 }
 0x141   :  { %156 = vadd.xlane.f32.xlu0 %v154_v33 }
 0x145   :  { %158 = vadd.xlane.f32.xlu0 %v155_v34 }
 0x1ce   :  { %v157_v35 = vpop.xlane.xlu0 %156 }
 0x1cf   :  { %v160_v36 = vmul.f32 0.03125, %v157_v35 }
 0x1d1   :  { %v162_v37 = vsub.f32 %v141_v31, %v160_v36 }
 0x1d2   :  { %v159_v38 = vpop.xlane.xlu0 %158 }
 0x1d3   :  { %v161_v39 = vmul.f32 0.03125, %v159_v38  ;;  %v164_v40 = vsel %vm151_vm0, %v162_v37, 0.0 }
 0x1d4   :  { %v166_v41 = vmul.f32 %v164_v40, %v164_v40 }
 0x1d5   :  { %v163_v42 = vsub.f32 %v146_v32, %v161_v39 }
 0x1d6   :  { %168 = vadd.xlane.f32.xlu1 %v166_v41 }
 0x1d7   :  { %v165_v43 = vsel %vm151_vm0, %v163_v42, 0.0 }
 0x1d8   :  { %v167_v44 = vmul.f32 %v165_v43, %v165_v43 }
 0x1da   :  { %170 = vadd.xlane.f32.xlu1 %v167_v44 }
 0x263   :  { %v169_v45 = vpop.xlane.xlu1 %168 }
 0x264   :  { %v172_v46 = vmul.f32 0.03125, %v169_v45 }
 0x266   :  { %v174_v47 = vadd.f32 1e-05, %v172_v46 }
 0x267   :  { %v171_v48 = vpop.xlane.xlu1 %170 }
 0x268   :  { %311 = vrsqrt.f32 %v174_v47  ;;  %v173_v49 = vmul.f32 0.03125, %v171_v48 }
 0x26a   :  { %v175_v50 = vadd.f32 1e-05, %v173_v49 }
 0x26c   :  { %313 = vrsqrt.f32 %v175_v50 }
 0x272   :  { %v312_v51 = vpop.eup %311 }
 0x273   :  { %v178_v53 = vmul.f32 %v312_v51, %v162_v37 }
 0x275   :  { %v187_v55 = vmul.f32 %v219_v52, %v178_v53 }
 0x276   :  { %v314_v56 = vpop.eup %313 }
 0x277   :  { %v179_v57 = vmul.f32 %v314_v56, %v163_v42  ;;  %v196_v58 = vadd.f32 %v220_v54, %v187_v55 }
 0x279   :  { %v188_v59 = vmul.f32 %v219_v52, %v179_v57  ;;  %198 = vst [vmem:[#allocation7] sm:$0xff] %v196_v58 }
 0x27b   :  { %v197_v60 = vadd.f32 %v220_v54, %v188_v59 }
 0x27d   :  { %199 = vst [vmem:[#allocation7 + $0x8] sm:$0xff] %v197_v60 }
 0x27e   :  { %370 = shalt.err (!%p367_p6)
}
 0x27f   :  { %s371_s25 = scalar_lea.hbm %s485_s5, 256 }
 0x280   :  { %p372_p7 = scmp.ne.s32.totalorder %s485_s5, %s371_s25  ;;  %p375_p8 = scmp.lt.u32.totalorder %s371_s25, %s485_s5 }
 0x282   :  { %p377_p9 = pnand %p375_p8, %p372_p7 }
 0x284   :  { %380 = shalt.err (!%p377_p9)
}
 0x285   :  { %211 = dma.vmem_to_hbm [thread:$0]  %s206_s23, 256, %s485_s5, [#allocation4], %s388_s28, %s388_s28, %s389_s29  }
 0x286   :  { %385 = dma.done.wait [#allocation4], 256  }
 0x287   :  { %386 = vsyncadd [#allocation4], 4294967040 }
 0x288   :  { %215 = vsyncpa [#allocation3], 1 }
 0x289   :  { %216 = vsyncpa [#allocation6], 1 }
 0x28a   :  { %217 = vsyncpa [#allocation4], 1 }

// kernel: tpu_custom_call.1
= control target key start
LH: loop header
LB: loop body
LE: loop exit
PB: predicated region body
PF: predicated region fallthrough
CT: control target
= control target key end

     0   :  { %10 = vsyncpa [#allocation3], 0  ;;  %s480_s0 = inlined_call_operand.hbm [shape: f32[16,128], index: 0, kind: input, shape index: {}]   ;;  %s481_s1 = inlined_call_operand.hbm [shape: f32[128,128], index: 1, kind: input, shape index: {}]   ;;  %s482_s2 = inlined_call_operand.vmem [shape: f32[1,128], index: 2, kind: input, shape index: {}]   ;;  %s483_s3 = inlined_call_operand.vmem [shape: f32[1,128], index: 3, kind: input, shape index: {}]   ;;  %s484_s4 = inlined_call_operand.vmem [shape: f32[1,128], index: 4, kind: input, shape index: {}]   ;;  %s485_s5 = inlined_call_operand.hbm [shape: f32[16,128], index: 5, kind: output, shape index: {}]  }
   0x1   :  { %11 = vsyncpa [#allocation6], 0 }
   0x2   :  { %12 = vsyncpa [#allocation4], 0  ;;  %s387_s18 = smov [#allocation2]   ;;  %s315_s22 = scalar_lea.hbm %s480_s0, 256 }
   0x3   :  { %s18_s19 = sshll.u32 %s387_s18, 4  ;;  %p316_p0 = scmp.ne.s32.totalorder %s480_s0, %s315_s22  ;;  %s19_s19 = int_to_ptr.vmem [resolvable:$true] %s18_s19 }
   0x4   :  { %p319_p1 = scmp.lt.u32.totalorder %s315_s22, %s480_s0 }
   0x6   :  { %p321_p2 = pnand %p319_p1, %p316_p0 }
   0x8   :  { %324 = shalt.err (!%p321_p2)
}
   0x9   :  { %s325_s27 = scalar_lea.vmem %s19_s19, 256  ;;  %p330_p4 = scmp.lt.s32.totalorder %s19_s19, %s19_s19 }
   0xa   :  { %p326_p3 = scmp.ne.s32.totalorder %s19_s19, %s325_s27  ;;  %p331_p5 = scmp.lt.s32.totalorder %s325_s27, %s325_s27 }
   0xc   :  { %p332_p6 = por %p331_p5, %p330_p4 }
   0xe   :  { %p333_p7 = pnand %p332_p6, %p326_p3 }
  0x10   :  { %336 = shalt.err (!%p333_p7)
}
  0x11   :  { %s388_s28 = smov 128   ;;  %s389_s29 = smov 8  }
  0x12   :  { %24 = dma.hbm_to_vmem [thread:$0]  %s480_s0, 256, %s19_s19, [#allocation3], %s388_s28, %s388_s28, %s389_s29  }
  0x13   :  { %s390_s7 = smov [#allocation5]   ;;  %s337_s11 = scalar_lea.hbm %s481_s1, 2048 }
  0x14   :  { %s30_s8 = sshll.u32 %s390_s7, 4  ;;  %p338_p8 = scmp.ne.s32.totalorder %s481_s1, %s337_s11  ;;  %s31_s8 = int_to_ptr.vmem [resolvable:$true] %s30_s8 }
  0x15   :  { %p341_p9 = scmp.lt.u32.totalorder %s337_s11, %s481_s1 }
  0x17   :  { %p343_p10 = pnand %p341_p9, %p338_p8 }
  0x19   :  { %346 = shalt.err (!%p343_p10)
}
  0x1a   :  { %s347_s16 = scalar_lea.vmem %s31_s8, 2048  ;;  %p352_p12 = scmp.lt.s32.totalorder %s31_s8, %s31_s8 }
  0x1b   :  { %p348_p11 = scmp.ne.s32.totalorder %s31_s8, %s347_s16  ;;  %p353_p13 = scmp.lt.s32.totalorder %s347_s16, %s347_s16 }
  0x1d   :  { %p354_p0 = por %p353_p13, %p352_p12 }
  0x1f   :  { %p355_p1 = pnand %p354_p0, %p348_p11 }
  0x21   :  { %358 = shalt.err (!%p355_p1)
}
  0x22   :  { %36 = dma.hbm_to_vmem [thread:$0]  %s481_s1, 2048, %s31_s8, [#allocation6], %s388_s28, %s388_s28, %s389_s29  }
  0x23   :  { %381 = dma.done.wait [#allocation3], 256  }
  0x24   :  { %382 = vsyncadd [#allocation3], 4294967040 }
  0x25   :  { %383 = dma.done.wait [#allocation6], 2048  }
  0x26   :  { %384 = vsyncadd [#allocation6], 4294965248  ;;  %v51_v0 = vld [vmem:[#allocation5] sm:$0xff]  ;;  %v52_v1 = vld [vmem:[#allocation5 + $0x8] sm:$0xff]  ;;  %v149_v26 = vlaneseq  ;;  %s391_s22 = smov [#allocation7]  }
  0x27   :  { %v53_v2 = vld [vmem:[#allocation5 + $0x10] sm:$0xff]  ;;  %v274_v3 = vpack.c.bf16 %v52_v1, %v51_v0  ;;  %v54_v4 = vld [vmem:[#allocation5 + $0x18] sm:$0xff]  ;;  %v55_v7 = vld [vmem:[#allocation5 + $0x20] sm:$0xff]  ;;  %s205_s23 = sshll.u32 %s391_s22, 4  ;;  %s206_s23 = int_to_ptr.vmem [resolvable:$true] %s205_s23 }
  0x28   :  { %v278_v5 = vpack.c.bf16 %v54_v4, %v53_v2  ;;  %v49_v6 = vld [vmem:[#allocation2] sm:$0xff]  ;;  %v56_v8 = vld [vmem:[#allocation5 + $0x28] sm:$0xff]  ;;  %v58_v11 = vld [vmem:[#allocation5 + $0x38] sm:$0xff]  ;;  %v150_v27 = vand.u32 127, %v149_v26  ;;  %s359_s24 = scalar_lea.vmem %s206_s23, 256  ;;  %p364_p3 = scmp.lt.s32.totalorder %s206_s23, %s206_s23 }
  0x29   :  { %275 = vmatprep.subr.bf16.mxu0 %v274_v3  ;;  %271 = vmatprep.mubr.f32.mxu0 %v49_v6  ;;  %v282_v9 = vpack.c.bf16 %v56_v8, %v55_v7  ;;  %v57_v10 = vld [vmem:[#allocation5 + $0x30] sm:$0xff]  ;;  %v59_v13 = vld [vmem:[#allocation5 + $0x40] sm:$0xff]  ;;  %v60_v14 = vld [vmem:[#allocation5 + $0x48] sm:$0xff]  ;;  %p360_p2 = scmp.ne.s32.totalorder %s206_s23, %s359_s24  ;;  %p365_p4 = scmp.lt.s32.totalorder %s359_s24, %s359_s24 }
  0x2a   :  { %277 = vmatpush3.bf16.xpose.msra.mxu0 %v274_v3  ;;  %v286_v12 = vpack.c.bf16 %v58_v11, %v57_v10  ;;  %v290_v15 = vpack.c.bf16 %v60_v14, %v59_v13  ;;  %v61_v16 = vld [vmem:[#allocation5 + $0x50] sm:$0xff]  ;;  %v62_v17 = vld [vmem:[#allocation5 + $0x58] sm:$0xff]  ;;  %v63_v19 = vld [vmem:[#allocation5 + $0x60] sm:$0xff]  ;;  %vm151_vm0 = vcmp.lt.s32.totalorder %v150_v27, 32 }
  0x2b   :  { %279 = vmatprep.subr.bf16.mxu0 %v278_v5  ;;  %v294_v18 = vpack.c.bf16 %v62_v17, %v61_v16  ;;  %v64_v20 = vld [vmem:[#allocation5 + $0x68] sm:$0xff]  ;;  %v65_v22 = vld [vmem:[#allocation5 + $0x70] sm:$0xff]  ;;  %v66_v23 = vld [vmem:[#allocation5 + $0x78] sm:$0xff]  ;;  %p366_p5 = por %p365_p4, %p364_p3 }
  0x2c   :  { %v298_v21 = vpack.c.bf16 %v64_v20, %v63_v19  ;;  %v302_v24 = vpack.c.bf16 %v66_v23, %v65_v22  ;;  %v50_v25 = vld [vmem:[#allocation2 + $0x8] sm:$0xff]  ;;  %v218_v28 = vld [vmem:[%s482_s2] ss:$0 sm:$0xff] }
  0x2d   :  { %v219_v52 = vld [vmem:[%s483_s3] ss:$0 sm:$0xff]  ;;  %p367_p6 = pnand %p366_p5, %p360_p2 }
  0x2e   :  { %v220_v54 = vld [vmem:[%s484_s4] ss:$0 sm:$0xff] }
  0x32   :  { %281 = vmatpush3.bf16.xpose.msra.mxu0 %v278_v5 }
  0x33   :  { %283 = vmatprep.subr.bf16.mxu0 %v282_v9 }
  0x3a   :  { %285 = vmatpush3.bf16.xpose.msra.mxu0 %v282_v9 }
  0x3b   :  { %287 = vmatprep.subr.bf16.mxu0 %v286_v12 }
  0x42   :  { %289 = vmatpush3.bf16.xpose.msra.mxu0 %v286_v12 }
  0x43   :  { %291 = vmatprep.subr.bf16.mxu0 %v290_v15 }
  0x4a   :  { %293 = vmatpush3.bf16.xpose.msra.mxu0 %v290_v15 }
  0x4b   :  { %295 = vmatprep.subr.bf16.mxu0 %v294_v18 }
  0x52   :  { %297 = vmatpush3.bf16.xpose.msra.mxu0 %v294_v18 }
  0x53   :  { %299 = vmatprep.subr.bf16.mxu0 %v298_v21 }
  0x5a   :  { %301 = vmatpush3.bf16.xpose.msra.mxu0 %v298_v21 }
  0x5b   :  { %303 = vmatprep.subr.bf16.mxu0 %v302_v24 }
  0x62   :  { %305 = vmatpush3.bf16.xpose.msra.mxu0 %v302_v24 }
  0x69   :  { %272 = vmatmul.mubr.f32.vlgmr.msra.gmra.mrb[0].mxu0 %v50_v25 }
 0x13c   :  { %v273_v29 = vpop.f32.mrb[0].mxu0 }
 0x13d   :  { %v140_v30 = vpop.f32.mrb[1].mxu0  ;;  %v146_v32 = vadd.f32 %v273_v29, %v218_v28 }
 0x13e   :  { %v141_v31 = vadd.f32 %v218_v28, %v140_v30 }
 0x13f   :  { %v155_v34 = vsel %vm151_vm0, %v146_v32, 0.0 }
 0x140   :  { %v154_v33 = vsel %vm151_vm0, %v141_v31, 0.0 }
 0x141   :  { %156 = vadd.xlane.f32.xlu0 %v154_v33 }
 0x145   :  { %158 = vadd.xlane.f32.xlu0 %v155_v34 }
 0x1ce   :  { %v157_v35 = vpop.xlane.xlu0 %156 }
 0x1cf   :  { %v160_v36 = vmul.f32 0.03125, %v157_v35 }
 0x1d1   :  { %v162_v37 = vsub.f32 %v141_v31, %v160_v36 }
 0x1d2   :  { %v159_v38 = vpop.xlane.xlu0 %158 }
 0x1d3   :  { %v161_v39 = vmul.f32 0.03125, %v159_v38  ;;  %v164_v40 = vsel %vm151_vm0, %v162_v37, 0.0 }
 0x1d4   :  { %v166_v41 = vmul.f32 %v164_v40, %v164_v40 }
 0x1d5   :  { %v163_v42 = vsub.f32 %v146_v32, %v161_v39 }
 0x1d6   :  { %168 = vadd.xlane.f32.xlu1 %v166_v41 }
 0x1d7   :  { %v165_v43 = vsel %vm151_vm0, %v163_v42, 0.0 }
 0x1d8   :  { %v167_v44 = vmul.f32 %v165_v43, %v165_v43 }
 0x1da   :  { %170 = vadd.xlane.f32.xlu1 %v167_v44 }
 0x263   :  { %v169_v45 = vpop.xlane.xlu1 %168 }
 0x264   :  { %v172_v46 = vmul.f32 0.03125, %v169_v45 }
 0x266   :  { %v174_v47 = vadd.f32 1e-05, %v172_v46 }
 0x267   :  { %v171_v48 = vpop.xlane.xlu1 %170 }
 0x268   :  { %311 = vrsqrt.f32 %v174_v47  ;;  %v173_v49 = vmul.f32 0.03125, %v171_v48 }
 0x26a   :  { %v175_v50 = vadd.f32 1e-05, %v173_v49 }
 0x26c   :  { %313 = vrsqrt.f32 %v175_v50 }
 0x272   :  { %v312_v51 = vpop.eup %311 }
 0x273   :  { %v178_v53 = vmul.f32 %v312_v51, %v162_v37 }
 0x275   :  { %v187_v55 = vmul.f32 %v219_v52, %v178_v53 }
 0x276   :  { %v314_v56 = vpop.eup %313 }
 0x277   :  { %v179_v57 = vmul.f32 %v314_v56, %v163_v42  ;;  %v196_v58 = vadd.f32 %v220_v54, %v187_v55 }
 0x279   :  { %v188_v59 = vmul.f32 %v219_v52, %v179_v57  ;;  %198 = vst [vmem:[#allocation7] sm:$0xff] %v196_v58 }
 0x27b   :  { %v197_v60 = vadd.f32 %v220_v54, %v188_v59 }
 0x27d   :  { %199 = vst [vmem:[#allocation7 + $0x8] sm:$0xff] %v197_v60 }
 0x27e   :  { %370 = shalt.err (!%p367_p6)
}
 0x27f   :  { %s371_s25 = scalar_lea.hbm %s485_s5, 256 }
 0x280   :  { %p372_p7 = scmp.ne.s32.totalorder %s485_s5, %s371_s25  ;;  %p375_p8 = scmp.lt.u32.totalorder %s371_s25, %s485_s5 }
 0x282   :  { %p377_p9 = pnand %p375_p8, %p372_p7 }
 0x284   :  { %380 = shalt.err (!%p377_p9)
}
 0x285   :  { %211 = dma.vmem_to_hbm [thread:$0]  %s206_s23, 256, %s485_s5, [#allocation4], %s388_s28, %s388_s28, %s389_s29  }
 0x286   :  { %385 = dma.done.wait [#allocation4], 256  }
 0x287   :  { %386 = vsyncadd [#allocation4], 4294967040 }
 0x288   :  { %215 = vsyncpa [#allocation3], 1 }
 0x289   :  { %216 = vsyncpa [#allocation6], 1 }
 0x28a   :  { %217 = vsyncpa [#allocation4], 1 }

</bundles_post_ra>
